<compile_context>
chip_gen: v5e
topology: v5e:2x2
jax: 0.10.0
libtpu: 0.0.40
codegen_flags: <defaults>
</compile_context>

<pallas_src>
import math

import jax
import jax.numpy as jnp
from jax.experimental import pallas as pl
from jax.experimental.pallas import tpu as pltpu

_LANE = 128


def _lcs_kernel(state_t_ref, control_t_ref, rand_t_ref, w_ref, out_ref):
    state_t = state_t_ref[...]        # (S,  Bt)   batch on the lane axis
    control_t = control_t_ref[...]    # (Cd, Bt)
    rand_t = rand_t_ref[...]          # (R,  Bt)

    r, bt = rand_t.shape
    cd = control_t.shape[0]

    # Batched outer product rand ⊗ control with batch on the lane axis:
    #   m[j*Cd + k, b] = rand[b, j] * control[b, k]     (sublane broadcast)
    m = (rand_t[:, None, :] * control_t[None, :, :]).reshape(r * cd, bt)

    # Single fused MXU matmul.  W already folds the identity (state
    # pass-through), step_size * {B, C} and sqrt(step_size) * D.
    x = jnp.concatenate([state_t, control_t, m], axis=0)        # (K, Bt)
    out_ref[...] = jnp.dot(
        w_ref[...], x, preferred_element_type=jnp.float32
    ).astype(out_ref.dtype)


def linear_controlled_step(state, control, random_effect, B, C, D, step_size,
                           *, batch_tile=1024):
    """state:(Bn,S)  control:(Bn,Cd)  random_effect:(Bn,R)
       B:(S,S)  C:(S,Cd)  D:(S,R,Cd)   ->   (Bn,S)"""
    Bn, S = state.shape
    Cd = control.shape[1]
    R = random_effect.shape[1]
    K = S + Cd + R * Cd
    dtype = state.dtype

    # Fold identity + step-size scaling into one stacked weight (weight
    # scaling done once in the wrapper, never per-tile in the kernel).
    w = jnp.concatenate(
        [jnp.eye(S, dtype=jnp.float32) + step_size * B.astype(jnp.float32),
         step_size * C.astype(jnp.float32),
         math.sqrt(step_size) * D.reshape(S, R * Cd).astype(jnp.float32)],
        axis=1).astype(dtype)                                   # (S, K)

    # Feature-major (batch on the lane axis) -> lane-dense output blocks.
    state_t = state.T                  # (S,  Bn)
    control_t = control.T              # (Cd, Bn)
    rand_t = random_effect.T           # (R,  Bn)

    # Batch (lane) tiling: full block for tiny batches, 128-aligned tiles
    # otherwise, zero padding so no rows are dropped.
    if Bn < 2 * _LANE:
        bt = Bn
    else:
        bt = min(batch_tile, Bn)
        bt -= bt % _LANE
    n_tiles = pl.cdiv(Bn, bt)
    Bp = n_tiles * bt
    if Bp != Bn:
        pad = ((0, 0), (0, Bp - Bn))
        state_t = jnp.pad(state_t, pad)
        control_t = jnp.pad(control_t, pad)
        rand_t = jnp.pad(rand_t, pad)

    itemsize = jnp.dtype(dtype).itemsize
    cost = pl.CostEstimate(
        flops=2 * Bp * K * S + 2 * Bp * R * Cd,
        transcendentals=0,
        bytes_accessed=itemsize * (Bp * (S + Cd + R) + S * K + Bp * S))

    out_t = pl.pallas_call(
        _lcs_kernel,
        out_shape=jax.ShapeDtypeStruct((S, Bp), dtype),
        grid=(n_tiles,),
        in_specs=[
            pl.BlockSpec((S, bt), lambda i: (0, i)),
            pl.BlockSpec((Cd, bt), lambda i: (0, i)),
            pl.BlockSpec((R, bt), lambda i: (0, i)),
            pl.BlockSpec((S, K), lambda i: (0, 0)),
        ],
        out_specs=pl.BlockSpec((S, bt), lambda i: (0, i)),
        compiler_params=pltpu.CompilerParams(
            dimension_semantics=("parallel",)),
        cost_estimate=cost,
    )(state_t, control_t, rand_t, w)

    return out_t[:, :Bn].T


def _reference(state, control, random_effect, B, C, D, step_size):
    drift = state @ B.T + control @ C.T
    diffusion = jnp.einsum('sjk,bk->bsj', D, control)
    rinc = jnp.einsum('bsj,bj->bs', diffusion, random_effect)
    return state + step_size * drift + math.sqrt(step_size) * rinc


if __name__ == "__main__":
    key = jax.random.PRNGKey(0)
    k_state, k_ctrl, k_rand, k_B, k_C, k_D = jax.random.split(key, 6)

    n_state, n_control, n_rand = 16, 8, 4
    step_size = 0.1

    # Deterministic synthetic "tensorrep" parameters (module __init__ shapes).
    B_rep = jax.random.normal(k_B, (n_state, n_state), jnp.float32) * 0.1
    C_rep = jax.random.normal(k_C, (n_state, n_control), jnp.float32) * 0.1
    D_rep = jax.random.normal(k_D, (n_state, n_rand, n_control), jnp.float32) * 0.1

    # --- small single-tile case (matches module toy usage) ---
    batch = 8
    state = jax.random.normal(k_state, (batch, n_state), jnp.float32)
    control = jax.random.normal(k_ctrl, (batch, n_control), jnp.float32)
    random_effect = jax.random.normal(k_rand, (batch, n_rand), jnp.float32)

    out = linear_controlled_step(state, control, random_effect,
                                 B_rep, C_rep, D_rep, step_size)
    out = jax.block_until_ready(out)
    ref = _reference(state, control, random_effect, B_rep, C_rep, D_rep,
                     step_size)
    assert out.shape == (batch, n_state)
    assert jnp.allclose(out, ref, atol=1e-4, rtol=1e-4), "mismatch (small)"

    # --- batch-tiled + padded path (grid of 3 lane tiles) ---
    batch2 = 300
    state2 = jax.random.normal(k_state, (batch2, n_state), jnp.float32)
    control2 = jax.random.normal(k_ctrl, (batch2, n_control), jnp.float32)
    rand2 = jax.random.normal(k_rand, (batch2, n_rand), jnp.float32)

    out2 = linear_controlled_step(state2, control2, rand2,
                                  B_rep, C_rep, D_rep, step_size,
                                  batch_tile=128)
    out2 = jax.block_until_ready(out2)
    ref2 = _reference(state2, control2, rand2, B_rep, C_rep, D_rep, step_size)
    assert out2.shape == (batch2, n_state)
    assert jnp.allclose(out2, ref2, atol=1e-4, rtol=1e-4), "mismatch (tiled)"

    print("KERNEL_OK")
</pallas_src>

<mosaic_0001>
module attributes {stable_mosaic.version = 11 : i64} {
  func.func @_lcs_kernel(%arg0: i32, %arg1: memref<16x8xf32, #tpu.memory_space<vmem>>, %arg2: memref<8x8xf32, #tpu.memory_space<vmem>>, %arg3: memref<4x8xf32, #tpu.memory_space<vmem>>, %arg4: memref<16x56xf32, #tpu.memory_space<vmem>>, %arg5: memref<16x8xf32, #tpu.memory_space<vmem>>) attributes {dimension_semantics = [#tpu.dimension_semantics<parallel>], iteration_bounds = array<i64: 1>, scalar_prefetch = 0 : i64, scratch_operands = 0 : i64, tpu.core_type = #tpu.core_type<tc>, window_params = [{transform_indices = @transform_0, window_bounds = array<i64: 16, 8>}, {transform_indices = @transform_1, window_bounds = array<i64: 8, 8>}, {transform_indices = @transform_2, window_bounds = array<i64: 4, 8>}, {pipeline_mode = #tpu.pipeline_mode<synchronous>, transform_indices = @transform_3, window_bounds = array<i64: 16, 56>}, {transform_indices = @transform_4, window_bounds = array<i64: 16, 8>}]} {
    %c0 = arith.constant 0 : index
    %c0_0 = arith.constant 0 : index
    %0 = vector.load %arg1[%c0, %c0_0] : memref<16x8xf32, #tpu.memory_space<vmem>>, vector<16x8xf32>
    %c0_1 = arith.constant 0 : index
    %c0_2 = arith.constant 0 : index
    %1 = vector.load %arg2[%c0_1, %c0_2] : memref<8x8xf32, #tpu.memory_space<vmem>>, vector<8x8xf32>
    %c0_3 = arith.constant 0 : index
    %c0_4 = arith.constant 0 : index
    %2 = vector.load %arg3[%c0_3, %c0_4] : memref<4x8xf32, #tpu.memory_space<vmem>>, vector<4x8xf32>
    %3 = vector.shape_cast %2 : vector<4x8xf32> to vector<4x1x8xf32>
    %4 = vector.shape_cast %1 : vector<8x8xf32> to vector<1x8x8xf32>
    %5 = vector.broadcast %3 : vector<4x1x8xf32> to vector<4x8x8xf32>
    %6 = vector.broadcast %4 : vector<1x8x8xf32> to vector<4x8x8xf32>
    %7 = arith.mulf %5, %6 : vector<4x8x8xf32>
    %8 = vector.shape_cast %7 : vector<4x8x8xf32> to vector<32x8xf32>
    %9 = tpu.concatenate %0, %1, %8 in 0 : vector<16x8xf32>, vector<8x8xf32>, vector<32x8xf32> -> vector<56x8xf32>
    %c0_5 = arith.constant 0 : index
    %c0_6 = arith.constant 0 : index
    %10 = vector.load %arg4[%c0_5, %c0_6] : memref<16x56xf32, #tpu.memory_space<vmem>>, vector<16x56xf32>
    %cst = arith.constant dense<0.000000e+00> : vector<16x8xf32>
    %11 = tpu.matmul %10, %9, %cst {dimension_numbers = #tpu.dot_dimension_numbers<[1], [0], [0], [1], [0, 0, 1, 1], [], []>} : vector<16x56xf32>, vector<56x8xf32>, vector<16x8xf32> -> vector<16x8xf32>
    %c0_7 = arith.constant 0 : index
    %c0_8 = arith.constant 0 : index
    %12 = vector.load %arg5[%c0_7, %c0_8] : memref<16x8xf32, #tpu.memory_space<vmem>>, vector<16x8xf32>
    tpu.vector_store %arg5[%c0_7, %c0_8], %11 {strides = array<i32>} : memref<16x8xf32, #tpu.memory_space<vmem>>, vector<16x8xf32>,
    return
  }
  func.func @transform_0(%arg0: i32) -> (i32, i32) {
    %c0_i32 = arith.constant 0 : i32
    %c0_i32_0 = arith.constant 0 : i32
    return %c0_i32, %arg0 : i32, i32
  }
  func.func @transform_1(%arg0: i32) -> (i32, i32) {
    %c0_i32 = arith.constant 0 : i32
    %c0_i32_0 = arith.constant 0 : i32
    return %c0_i32, %arg0 : i32, i32
  }
  func.func @transform_2(%arg0: i32) -> (i32, i32) {
    %c0_i32 = arith.constant 0 : i32
    %c0_i32_0 = arith.constant 0 : i32
    return %c0_i32, %arg0 : i32, i32
  }
  func.func @transform_3(%arg0: i32) -> (i32, i32) {
    %c0_i32 = arith.constant 0 : i32
    %c0_i32_0 = arith.constant 0 : i32
    %c0_i32_1 = arith.constant 0 : i32
    return %c0_i32, %c0_i32_0 : i32, i32
  }
  func.func @transform_4(%arg0: i32) -> (i32, i32) {
    %c0_i32 = arith.constant 0 : i32
    %c0_i32_0 = arith.constant 0 : i32
    return %c0_i32, %arg0 : i32, i32
  }
}

</mosaic_0001>

<bundles_post_ra>
// kernel: tpu_custom_call.1
= control target key start
LH: loop header
LB: loop body
LE: loop exit
PB: predicated region body
PF: predicated region fallthrough
CT: control target
= control target key end

     0   :  { %9 = vsyncpa [#allocation3], 0  ;;  %s127_s18 = smov [#allocation2]   ;;  %s177_s0 = inlined_call_operand.vmem [shape: f32[16,8], index: 0, kind: input, shape index: {}]   ;;  %s178_s1 = inlined_call_operand.vmem [shape: f32[8,8], index: 1, kind: input, shape index: {}]   ;;  %s179_s2 = inlined_call_operand.hbm [shape: f32[4,8], index: 2, kind: input, shape index: {}]   ;;  %s180_s3 = inlined_call_operand.vmem [shape: f32[16,56], index: 3, kind: input, shape index: {}]   ;;  %s181_s4 = inlined_call_operand.vmem [shape: f32[16,8], index: 4, kind: output, shape index: {}]  }
   0x1   :  { %s19_s17 = sshll.u32 %s179_s2, 4  ;;  %s21_s19 = sshll.u32 %s127_s18, 4  ;;  %s20_s17 = int_to_ptr.hbm [resolvable:$true] %s19_s17  ;;  %s22_s19 = int_to_ptr.vmem [resolvable:$true] %s21_s19 }
   0x2   :  { %24 = dma.hbm_to_vmem [thread:$0]  %s20_s17, 64, %s22_s19, [#allocation3]  }
   0x3   :  { %125 = dma.done.wait [#allocation3], 64  }
   0x4   :  { %126 = vsyncadd [#allocation3], 4294967232  ;;  %v34_v0 = vld [vmem:[#allocation2] sm:$0xf]  ;;  %v32_v13 = vld [vmem:[%s177_s0 + $0x8] sm:$0xff]  ;;  %vm53_vm0 = vcmask 457728  }
   0x5   :  { %v38_v1 = vrot.slane %v34_v0, 3  ;;  %v37_v2 = vrot.slane %v34_v0, 2  ;;  %v36_v3 = vrot.slane %v34_v0, 1  ;;  %v33_v4 = vld [vmem:[%s178_s1] sm:$0xff]  ;;  %v39_v10 = vperm.slane %v34_v0, 0  ;;  %v52_v16 = vld [vmem:[%s180_s3 + $0x8] sm:$0xff] }
   0x6   :  { %v31_v14 = vld [vmem:[%s177_s0] sm:$0xff]  ;;  %vm83_vm1 = vcmask 64512  }
   0x7   :  { %v42_v5 = vperm.slane %v38_v1, 0  ;;  %v41_v6 = vperm.slane %v37_v2, 0  ;;  %v40_v7 = vperm.slane %v36_v3, 0  ;;  %v47_v12 = vmul.f32 %v39_v10, %v33_v4  ;;  %v51_v15 = vld [vmem:[%s180_s3] sm:$0xff] }
   0x9   :  { %v50_v8 = vmul.f32 %v42_v5, %v33_v4  ;;  %v49_v9 = vmul.f32 %v41_v6, %v33_v4  ;;  %v48_v11 = vmul.f32 %v40_v7, %v33_v4 }
   0xb   :  { %69 = vmatpush.msra.mxu0 %v50_v8  ;;  %93 = vmatpush.msra.mxu1 %v50_v8 }
   0xd   :  { %70 = vmatpush.msra.mxu0 %v49_v9  ;;  %94 = vmatpush.msra.mxu1 %v49_v9 }
   0xf   :  { %71 = vmatpush.msra.mxu0 %v48_v11  ;;  %95 = vmatpush.msra.mxu1 %v48_v11 }
  0x11   :  { %72 = vmatpush.msra.mxu0 %v47_v12  ;;  %96 = vmatpush.msra.mxu1 %v47_v12 }
  0x13   :  { %73 = vmatpush.msra.mxu0 %v33_v4  ;;  %97 = vmatpush.msra.mxu1 %v33_v4 }
  0x15   :  { %74 = vmatpush.msra.mxu0 %v32_v13  ;;  %98 = vmatpush.msra.mxu1 %v32_v13 }
  0x17   :  { %75 = vmatpush.msra.mxu0 %v31_v14  ;;  %99 = vmatpush.msra.mxu1 %v31_v14 }
  0x18   :  { %91 = vmatmul.msk.f32.vlgmr.msra.gmra.mxu0 %vm53_vm0, %v51_v15  ;;  %92 = vmatmul.msk.f32.vlgmr.msra.gmra.mxu1 %vm53_vm0, %v52_v16 }
  0x95   :  { %v77_v17 = vpop.f32.mrf.mxu0  ;;  %v80_v18 = vpop.f32.mrf.mxu1 }
  0x96   :  { %84 = vst.msk [vmem:[%s181_s4] sm:$0xff] %vm83_vm1, %v77_v17 }
  0x97   :  { %85 = vst.msk [vmem:[%s181_s4 + $0x8] sm:$0xff] %vm83_vm1, %v80_v18 }
  0x98   :  { %90 = vsyncpa [#allocation3], 1 }

</bundles_post_ra>
